<compile_context>
chip_gen: v7x
topology: tpu7x:2x2x1
jax: 0.10.0
libtpu: 0.0.40
codegen_flags: <defaults>
</compile_context>

<pallas_src>
import functools

import jax
import jax.numpy as jnp
from jax.experimental import pallas as pl
from jax.experimental.pallas import tpu as pltpu

D_MODEL = 96
N_LAYERS = 2


def _highway_kernel(x_ref, w_ref, b_ref, o_ref, *, n_layers, d):
    """One (D, tl) slab of the (B, D, L) input; all layers applied in-register.

    x_ref: (D, tl)        channels on sublanes, sequence positions on lanes
    w_ref: (n, 2D, D)     per-layer fused [gate_W ; linear_W], PyTorch (out,in)
    b_ref: (n, 2D, 1)     per-layer fused [gate_b ; linear_b] (f32)
    o_ref: (D, tl)
    """
    x = x_ref[...].astype(jnp.float32)
    w = w_ref[...]                       # tiny (n, 2D, D); bf16 or f32
    b = b_ref[...].astype(jnp.float32)
    for i in range(n_layers):            # static unroll; n_layers small & fixed
        # Single fused MXU call per layer: (2D, D) @ (D, tl) -> (2D, tl),
        # operands in w.dtype (bf16 fast path), accumulation in f32.
        z = jnp.dot(w[i], x.astype(w.dtype),
                    preferred_element_type=jnp.float32) + b[i]
        # sigmoid via one tanh (single EUP op): sigmoid(t) = 0.5*tanh(t/2)+0.5
        gate = 0.5 * jnp.tanh(0.5 * z[:d, :]) + 0.5
        nonlinear = jnp.maximum(z[d:, :], 0.0)
        # gate * nonlinear + (1 - gate) * x, with one fewer mul/sub:
        x = x + gate * (nonlinear - x)
    o_ref[...] = x.astype(o_ref.dtype)


def fuse_highway_params(linear_w, linear_b, gate_w, gate_b,
                        *, matmul_dtype=jnp.bfloat16):
    """Fold per-layer gate/linear params into fused kernel operands (call once).

    PyTorch nn.Linear (out, in) layout is kept as-is (kernel contracts W @ x).
    linear_w / gate_w: (n, D, D);  linear_b / gate_b: (n, D).
    Returns fused_w (n, 2D, D) in `matmul_dtype`, fused_b (n, 2D, 1) in f32;
    rows [0:D] = gate, rows [D:2D] = linear.
    """
    fused_w = jnp.concatenate([gate_w, linear_w], axis=1).astype(matmul_dtype)
    fused_b = jnp.concatenate([gate_b, linear_b], axis=1)[..., None]
    return fused_w, fused_b.astype(jnp.float32)


def _plan_tiles(B, L, *, max_tile=2048, min_total_steps=4):
    """Pick (padded_L, lane_tile).

    * L <= max_tile: no padding; full-extent tile unless L is a 128-multiple
      and a smaller 128-multiple divisor yields >= min_total_steps grid steps.
    * L  > max_tile: pad L up to a multiple of 128 and use the largest
      128-multiple divisor <= max_tile that still gives >= min_total_steps.
    """
    if L <= max_tile:
        if L % 128 == 0:
            t = L
            while t >= 128:
                if L % t == 0 and B * (L // t) >= min_total_steps:
                    return L, t
                t -= 128
        return L, L
    Lp = -(-L // 128) * 128
    cap = max_tile - (max_tile % 128)
    largest = None
    t = cap
    while t >= 128:
        if Lp % t == 0:
            if largest is None:
                largest = t
            if B * (Lp // t) >= min_total_steps:
                return Lp, t
        t -= 128
    return Lp, largest


def highway_pallas(x, fused_w, fused_b, *, tl=None, max_tile=2048):
    """x: (B, D, L) -> (B, D, L), matching the PyTorch module semantics."""
    B, D, L = x.shape
    n, two_d, d_in = fused_w.shape
    assert d_in == D and two_d == 2 * D, "fused weight shape mismatch"
    assert D % 8 == 0, "d_model must be a multiple of 8 (sublane tiling)"

    if tl is None:
        Lp, tl = _plan_tiles(B, L, max_tile=max_tile)
    else:
        assert L % tl == 0 and (tl == L or tl % 128 == 0), "bad user lane tile"
        Lp = L
    assert Lp % tl == 0 and (tl == Lp or tl % 128 == 0), "bad lane tile"

    # Pad awkward L to a 128-multiple so every block stays small & lane-dense;
    # padded columns are computed (finite, no NaNs) and sliced off below.
    xp = x if Lp == L else jnp.pad(x, ((0, 0), (0, 0), (0, Lp - L)))

    kernel = functools.partial(_highway_kernel, n_layers=n, d=D)

    w_bytes = (fused_w.size * fused_w.dtype.itemsize
               + fused_b.size * fused_b.dtype.itemsize)
    cost = pl.CostEstimate(
        flops=2 * n * B * Lp * (2 * D) * D,
        transcendentals=n * B * D * Lp,
        bytes_accessed=2 * B * D * Lp * x.dtype.itemsize + w_bytes,
    )

    # Weights/biases are grid-invariant (constant index_map), so Pallas keeps
    # them resident across grid steps; no pipeline_mode override needed.
    out = pl.pallas_call(
        kernel,
        out_shape=jax.ShapeDtypeStruct((B, D, Lp), x.dtype),
        grid_spec=pltpu.PrefetchScalarGridSpec(
            num_scalar_prefetch=0,
            grid=(B, Lp // tl),
            in_specs=[
                pl.BlockSpec((None, D, tl), lambda b, l: (b, 0, l)),   # x slab
                pl.BlockSpec((n, 2 * D, D), lambda b, l: (0, 0, 0)),   # fused W
                pl.BlockSpec((n, 2 * D, 1), lambda b, l: (0, 0, 0)),   # fused b
            ],
            out_specs=pl.BlockSpec((None, D, tl), lambda b, l: (b, 0, l)),
        ),
        compiler_params=pltpu.CompilerParams(
            dimension_semantics=("parallel", "parallel"),
        ),
        cost_estimate=cost,
    )(xp, fused_w, fused_b)

    return out if Lp == L else out[:, :, :L]


def highway_ref(x, linear_w, linear_b, gate_w, gate_b):
    """Pure-JAX reference mirroring the PyTorch forward exactly (f32)."""
    xt = jnp.transpose(x, (0, 2, 1))                 # (B, L, D)
    n = linear_w.shape[0]
    for i in range(n):
        gate = jax.nn.sigmoid(jnp.einsum("bld,od->blo", xt, gate_w[i]) + gate_b[i])
        nonlinear = jax.nn.relu(jnp.einsum("bld,od->blo", xt, linear_w[i]) + linear_b[i])
        xt = gate * nonlinear + (1.0 - gate) * xt
    return jnp.transpose(xt, (0, 2, 1))


if __name__ == "__main__":
    key = jax.random.PRNGKey(0)
    D, n = D_MODEL, N_LAYERS
    B, L = 2, 8

    k_x, k_lw, k_lb, k_gw, k_gb, k_x2 = jax.random.split(key, 6)
    # Deterministic synthetic parameters (nn.Linear-style scale 1/sqrt(D)).
    bound = 1.0 / (D ** 0.5)
    x = jax.random.normal(k_x, (B, D, L), dtype=jnp.float32)
    linear_w = jax.random.uniform(k_lw, (n, D, D), jnp.float32, -bound, bound)
    linear_b = jax.random.uniform(k_lb, (n, D), jnp.float32, -bound, bound)
    gate_w = jax.random.uniform(k_gw, (n, D, D), jnp.float32, -bound, bound)
    gate_b = jax.random.uniform(k_gb, (n, D), jnp.float32, -bound, bound)

    ref = highway_ref(x, linear_w, linear_b, gate_w, gate_b)

    # 1) Exact-math path (f32 matmul operands): tight tolerance vs reference.
    fw32, fb = fuse_highway_params(linear_w, linear_b, gate_w, gate_b,
                                   matmul_dtype=jnp.float32)
    out32 = jax.block_until_ready(highway_pallas(x, fw32, fb))
    assert out32.shape == (B, D, L), out32.shape
    assert jnp.allclose(out32, ref, atol=1e-4, rtol=1e-4), "f32 path mismatch"

    # 2) Fast path (bf16 matmul operands, f32 accumulation & elementwise).
    fwbf, _ = fuse_highway_params(linear_w, linear_b, gate_w, gate_b)
    outbf = jax.block_until_ready(highway_pallas(x, fwbf, fb))
    assert jnp.allclose(outbf, ref, atol=3e-2, rtol=3e-2), "bf16 path mismatch"

    # 3) Non-128-multiple L > max_tile: exercises the pad-to-128 tiling path.
    L2 = 2500
    x2 = jax.random.normal(k_x2, (1, D, L2), dtype=jnp.float32)
    ref2 = highway_ref(x2, linear_w, linear_b, gate_w, gate_b)
    out2 = jax.block_until_ready(highway_pallas(x2, fwbf, fb))
    assert out2.shape == (1, D, L2), out2.shape
    assert jnp.allclose(out2, ref2, atol=3e-2, rtol=3e-2), "padded path mismatch"

    print("KERNEL_OK")
</pallas_src>

<mosaic_0001>
module attributes {stable_mosaic.version = 11 : i64} {
  func.func @_highway_kernel(%arg0: i32, %arg1: i32, %arg2: memref<1x96x8xf32, #tpu.memory_space<vmem>>, %arg3: memref<2x192x96xf32, #tpu.memory_space<vmem>>, %arg4: memref<2x192x1xf32, #tpu.memory_space<vmem>>, %arg5: memref<1x96x8xf32, #tpu.memory_space<vmem>>) attributes {dimension_semantics = [#tpu.dimension_semantics<parallel>, #tpu.dimension_semantics<parallel>], iteration_bounds = array<i64: 2, 1>, scalar_prefetch = 0 : i64, scratch_operands = 0 : i64, tpu.core_type = #tpu.core_type<tc>, window_params = [{transform_indices = @transform_0, window_bounds = array<i64: 1, 96, 8>}, {pipeline_mode = #tpu.pipeline_mode<synchronous>, transform_indices = @transform_1, window_bounds = array<i64: 2, 192, 96>}, {pipeline_mode = #tpu.pipeline_mode<synchronous>, transform_indices = @transform_2, window_bounds = array<i64: 2, 192, 1>}, {transform_indices = @transform_3, window_bounds = array<i64: 1, 96, 8>}]} {
    %c0 = arith.constant 0 : index
    %c0_0 = arith.constant 0 : index
    %c0_1 = arith.constant 0 : index
    %0 = vector.load %arg2[%c0, %c0_0, %c0_1] : memref<1x96x8xf32, #tpu.memory_space<vmem>>, vector<1x96x8xf32>
    %1 = vector.shape_cast %0 : vector<1x96x8xf32> to vector<96x8xf32>
    %c0_2 = arith.constant 0 : index
    %c0_3 = arith.constant 0 : index
    %c0_4 = arith.constant 0 : index
    %2 = vector.load %arg3[%c0_2, %c0_3, %c0_4] : memref<2x192x96xf32, #tpu.memory_space<vmem>>, vector<2x192x96xf32>
    %c0_5 = arith.constant 0 : index
    %c0_6 = arith.constant 0 : index
    %c0_7 = arith.constant 0 : index
    %3 = vector.load %arg4[%c0_5, %c0_6, %c0_7] : memref<2x192x1xf32, #tpu.memory_space<vmem>>, vector<2x192x1xf32>
    %4 = vector.extract_strided_slice %2 {offsets = [0, 0, 0], sizes = [1, 192, 96], strides = [1, 1, 1]} : vector<2x192x96xf32> to vector<1x192x96xf32>
    %5 = vector.shape_cast %4 : vector<1x192x96xf32> to vector<192x96xf32>
    %cst = arith.constant dense<0.000000e+00> : vector<192x8xf32>
    %6 = tpu.matmul %5, %1, %cst {dimension_numbers = #tpu.dot_dimension_numbers<[1], [0], [0], [1], [0, 0, 1, 1], [], []>} : vector<192x96xf32>, vector<96x8xf32>, vector<192x8xf32> -> vector<192x8xf32>
    %7 = vector.extract_strided_slice %3 {offsets = [0, 0, 0], sizes = [1, 192, 1], strides = [1, 1, 1]} : vector<2x192x1xf32> to vector<1x192x1xf32>
    %8 = vector.shape_cast %7 : vector<1x192x1xf32> to vector<192x1xf32>
    %9 = vector.broadcast %8 : vector<192x1xf32> to vector<192x8xf32>
    %10 = arith.addf %6, %9 : vector<192x8xf32>
    %11 = vector.extract_strided_slice %10 {offsets = [0, 0], sizes = [96, 8], strides = [1, 1]} : vector<192x8xf32> to vector<96x8xf32>
    %cst_8 = arith.constant 5.000000e-01 : f32
    %12 = vector.broadcast %cst_8 : f32 to vector<96x8xf32>
    %13 = arith.mulf %12, %11 : vector<96x8xf32>
    %14 = math.tanh %13 : vector<96x8xf32>
    %cst_9 = arith.constant 5.000000e-01 : f32
    %15 = vector.broadcast %cst_9 : f32 to vector<96x8xf32>
    %16 = arith.mulf %15, %14 : vector<96x8xf32>
    %cst_10 = arith.constant 5.000000e-01 : f32
    %17 = vector.broadcast %cst_10 : f32 to vector<96x8xf32>
    %18 = arith.addf %16, %17 : vector<96x8xf32>
    %19 = vector.extract_strided_slice %10 {offsets = [96, 0], sizes = [96, 8], strides = [1, 1]} : vector<192x8xf32> to vector<96x8xf32>
    %cst_11 = arith.constant 0.000000e+00 : f32
    %20 = vector.broadcast %cst_11 : f32 to vector<96x8xf32>
    %21 = arith.maximumf %19, %20 : vector<96x8xf32>
    %22 = arith.subf %21, %1 : vector<96x8xf32>
    %23 = arith.mulf %18, %22 : vector<96x8xf32>
    %24 = arith.addf %1, %23 : vector<96x8xf32>
    %25 = vector.extract_strided_slice %2 {offsets = [1, 0, 0], sizes = [1, 192, 96], strides = [1, 1, 1]} : vector<2x192x96xf32> to vector<1x192x96xf32>
    %26 = vector.shape_cast %25 : vector<1x192x96xf32> to vector<192x96xf32>
    %cst_12 = arith.constant dense<0.000000e+00> : vector<192x8xf32>
    %27 = tpu.matmul %26, %24, %cst_12 {dimension_numbers = #tpu.dot_dimension_numbers<[1], [0], [0], [1], [0, 0, 1, 1], [], []>} : vector<192x96xf32>, vector<96x8xf32>, vector<192x8xf32> -> vector<192x8xf32>
    %28 = vector.extract_strided_slice %3 {offsets = [1, 0, 0], sizes = [1, 192, 1], strides = [1, 1, 1]} : vector<2x192x1xf32> to vector<1x192x1xf32>
    %29 = vector.shape_cast %28 : vector<1x192x1xf32> to vector<192x1xf32>
    %30 = vector.broadcast %29 : vector<192x1xf32> to vector<192x8xf32>
    %31 = arith.addf %27, %30 : vector<192x8xf32>
    %32 = vector.extract_strided_slice %31 {offsets = [0, 0], sizes = [96, 8], strides = [1, 1]} : vector<192x8xf32> to vector<96x8xf32>
    %cst_13 = arith.constant 5.000000e-01 : f32
    %33 = vector.broadcast %cst_13 : f32 to vector<96x8xf32>
    %34 = arith.mulf %33, %32 : vector<96x8xf32>
    %35 = math.tanh %34 : vector<96x8xf32>
    %cst_14 = arith.constant 5.000000e-01 : f32
    %36 = vector.broadcast %cst_14 : f32 to vector<96x8xf32>
    %37 = arith.mulf %36, %35 : vector<96x8xf32>
    %cst_15 = arith.constant 5.000000e-01 : f32
    %38 = vector.broadcast %cst_15 : f32 to vector<96x8xf32>
    %39 = arith.addf %37, %38 : vector<96x8xf32>
    %40 = vector.extract_strided_slice %31 {offsets = [96, 0], sizes = [96, 8], strides = [1, 1]} : vector<192x8xf32> to vector<96x8xf32>
    %cst_16 = arith.constant 0.000000e+00 : f32
    %41 = vector.broadcast %cst_16 : f32 to vector<96x8xf32>
    %42 = arith.maximumf %40, %41 : vector<96x8xf32>
    %43 = arith.subf %42, %24 : vector<96x8xf32>
    %44 = arith.mulf %39, %43 : vector<96x8xf32>
    %45 = arith.addf %24, %44 : vector<96x8xf32>
    %c0_17 = arith.constant 0 : index
    %c0_18 = arith.constant 0 : index
    %c0_19 = arith.constant 0 : index
    %46 = vector.load %arg5[%c0_17, %c0_18, %c0_19] : memref<1x96x8xf32, #tpu.memory_space<vmem>>, vector<1x96x8xf32>
    %47 = vector.shape_cast %46 : vector<1x96x8xf32> to vector<96x8xf32>
    %48 = vector.shape_cast %45 : vector<96x8xf32> to vector<1x96x8xf32>
    tpu.vector_store %arg5[%c0_17, %c0_18, %c0_19], %48 {strides = array<i32>} : memref<1x96x8xf32, #tpu.memory_space<vmem>>, vector<1x96x8xf32>,
    return
  }
  func.func @transform_0(%arg0: i32, %arg1: i32) -> (i32, i32, i32) {
    %c0_i32 = arith.constant 0 : i32
    %c0_i32_0 = arith.constant 0 : i32
    return %arg0, %c0_i32, %arg1 : i32, i32, i32
  }
  func.func @transform_1(%arg0: i32, %arg1: i32) -> (i32, i32, i32) {
    %c0_i32 = arith.constant 0 : i32
    %c0_i32_0 = arith.constant 0 : i32
    %c0_i32_1 = arith.constant 0 : i32
    %c0_i32_2 = arith.constant 0 : i32
    return %c0_i32, %c0_i32_0, %c0_i32_1 : i32, i32, i32
  }
  func.func @transform_2(%arg0: i32, %arg1: i32) -> (i32, i32, i32) {
    %c0_i32 = arith.constant 0 : i32
    %c0_i32_0 = arith.constant 0 : i32
    %c0_i32_1 = arith.constant 0 : i32
    %c0_i32_2 = arith.constant 0 : i32
    return %c0_i32, %c0_i32_0, %c0_i32_1 : i32, i32, i32
  }
  func.func @transform_3(%arg0: i32, %arg1: i32) -> (i32, i32, i32) {
    %c0_i32 = arith.constant 0 : i32
    %c0_i32_0 = arith.constant 0 : i32
    return %arg0, %c0_i32, %arg1 : i32, i32, i32
  }
}

</mosaic_0001>

<bundles_post_ra>
// kernel: tpu_custom_call.1
= control target key start
LH: loop header
LB: loop body
LE: loop exit
PB: predicated region body
PF: predicated region fallthrough
CT: control target
= control target key end

     0   :  { %s1771_s12 = smov 0   ;;  %s1773_s13 = smov 0   ;;  %s2307_s0 = inlined_call_operand.vmem [shape: f32[2,96,8], index: 0, kind: input, shape index: {}]   ;;  %s2308_s1 = inlined_call_operand.vmem [shape: f32[2,192,96], index: 1, kind: input, shape index: {}]   ;;  %s2309_s2 = inlined_call_operand.vmem [shape: f32[2,192,1], index: 2, kind: input, shape index: {}]   ;;  %s2310_s3 = inlined_call_operand.vmem [shape: f32[2,96,8], index: 3, kind: output, shape index: {}]  }
   0x1   :  { %s1775_s14 = smov 0  }
   0x2 LB: > { %s25_s15 = sadd.s32 1, %s1744_s13  ;;  %p1357_p0 = scmp.ge.s32.totalorder %s1748_s14, 1  ;;  %s1748_s14 = sphi %s1775_s14, %s13_s14   ;;  %s1744_s13 = sphi %s1773_s13, %s2312_s13   ;;  %s1740_s12 = sphi %s1771_s12, %s2311_s12  }
   0x3   : > { %p27_p1 = scmp.ge.s32.totalorder %s25_s15, 2  ;;  %p156_p2 = scmp.lt.s32.totalorder %s1748_s14, 3 }
   0x5   : > { %s2314_s15 = smov (%p27_p1, %s25_s15), 0  ;;  %p157_p3 = pnand %p1357_p0, %p156_p2 }
   0x6   : > { %p186_p4 = scmp.lt.s32.totalorder (!%p157_p3), %s1740_s12, 1  ;;  %v264_v0 = vld [vmem:[%s2309_s2 + $0x10] sm:$0xff] (!%p157_p3)  ;;  %v262_v1 = vld [vmem:[%s2309_s2] sm:$0xff] (!%p157_p3)  ;;  %vm430_vm0 = vcmask (!%p157_p3), 785408   ;;  %v1750_v2 = vmov (!%p157_p3), 0   ;;  %v265_v4 = vld [vmem:[%s2309_s2 + $0x18] sm:$0xff] (!%p157_p3) }
   0x7   : > { %160 = sbr.rel (%p157_p3) target bundleno = 586 (0x24a), region = 32  ;;  %1677 = vset.pattern.permute.xlu1 (!%p157_p3), %v1750_v2  ;;  %1676 = vset.pattern.permute.xlu0 (!%p157_p3), %v1750_v2  ;;  %v214_v3 = vld [vmem:[%s2308_s1] sm:$0xff] (!%p157_p3)  ;;  %v263_v5 = vld [vmem:[%s2309_s2 + $0x8] sm:$0xff] (!%p157_p3)  ;;  %v269_v16 = vld [vmem:[%s2309_s2 + $0x38] sm:$0xff] (!%p157_p3)  ;;  %vm1257_vm1 = vcmask (!%p157_p3), 64512  }
   0x8   : > { %322 = vperm.xlu1 (!%p157_p3), %1677, %v264_v0   ;;  %312 = vperm.xlu0 (!%p157_p3), %1676, %v262_v1   ;;  %v267_v6 = vld [vmem:[%s2309_s2 + $0x28] sm:$0xff] (!%p157_p3)  ;;  %v266_v12 = vld [vmem:[%s2309_s2 + $0x20] sm:$0xff] (!%p157_p3)  ;;  %v268_v18 = vld [vmem:[%s2309_s2 + $0x30] sm:$0xff] (!%p157_p3) }
   0x9   : > { %1506 = vmatprep.mubr.msk.f32.mxu0 (!%p157_p3), %vm430_vm0, %v214_v3  ;;  %v275_v21 = vld [vmem:[%s2309_s2 + $0x68] sm:$0xff] (!%p157_p3)  ;;  %v274_v23 = vld [vmem:[%s2309_s2 + $0x60] sm:$0xff] (!%p157_p3)  ;;  %v277_v31 = vld [vmem:[%s2309_s2 + $0x78] sm:$0xff] (!%p157_p3) }
   0xa   : > { %v271_v26 = vld [vmem:[%s2309_s2 + $0x48] sm:$0xff] (!%p157_p3)  ;;  %v270_v28 = vld [vmem:[%s2309_s2 + $0x40] sm:$0xff] (!%p157_p3)  ;;  %v276_v33 = vld [vmem:[%s2309_s2 + $0x70] sm:$0xff] (!%p157_p3) }
   0xb   : > { %v273_v34 = vld [vmem:[%s2309_s2 + $0x58] sm:$0xff] (!%p157_p3)  ;;  %v272_v35 = vld [vmem:[%s2309_s2 + $0x50] sm:$0xff] (!%p157_p3)  ;;  %v215_v36 = vld [vmem:[%s2308_s1 + $0x8] sm:$0xff] (!%p157_p3) }
   0xc   : > { %327 = vperm.xlu1 (!%p157_p3), %1677, %v265_v4   ;;  %317 = vperm.xlu0 (!%p157_p3), %1676, %v263_v5   ;;  %v279_v37 = vld [vmem:[%s2309_s2 + $0x88] sm:$0xff] (!%p157_p3)  ;;  %v216_v38 = vld [vmem:[%s2308_s1 + $0x10] sm:$0xff] (!%p157_p3)  ;;  %v278_v39 = vld [vmem:[%s2309_s2 + $0x80] sm:$0xff] (!%p157_p3) }
   0xd   : > { %v217_v40 = vld [vmem:[%s2308_s1 + $0x18] sm:$0xff] (!%p157_p3)  ;;  %v218_v42 = vld [vmem:[%s2308_s1 + $0x20] sm:$0xff] (!%p157_p3)  ;;  %v280_v43 = vld [vmem:[%s2309_s2 + $0x90] sm:$0xff] (!%p157_p3) }
   0xe   : > { %s2316_s12 = smov (!%p186_p4, %s1740_s12), 1  ;;  %v281_v41 = vld [vmem:[%s2309_s2 + $0x98] sm:$0xff]  ;;  %v219_v44 = vld [vmem:[%s2308_s1 + $0x28] sm:$0xff]  ;;  %v220_v46 = vld [vmem:[%s2308_s1 + $0x30] sm:$0xff] }
   0xf   : > { %s1650_s26 = smul.u32 96, %s2316_s12  ;;  %v283_v45 = vld [vmem:[%s2309_s2 + $0xa8] sm:$0xff]  ;;  %v282_v47 = vld [vmem:[%s2309_s2 + $0xa0] sm:$0xff]  ;;  %v221_v48 = vld [vmem:[%s2308_s1 + $0x38] sm:$0xff] }
  0x10   : > { %337 = vperm.xlu1 %1677, %v267_v6   ;;  %332 = vperm.xlu0 %1676, %v266_v12   ;;  %v285_v49 = vld [vmem:[%s2309_s2 + $0xb8] sm:$0xff]  ;;  %v222_v50 = vld [vmem:[%s2308_s1 + $0x40] sm:$0xff]  ;;  %v284_v51 = vld [vmem:[%s2309_s2 + $0xb0] sm:$0xff] }
  0x11   : > { %s1813_s29 = scalar_lea.vmem %s2307_s0, %s1650_s26  ;;  %v223_v52 = vld [vmem:[%s2308_s1 + $0x48] sm:$0xff]  ;;  %v224_v54 = vld [vmem:[%s2308_s1 + $0x50] sm:$0xff]  ;;  %v286_v55 = vld [vmem:[%s2309_s2 + $0xc0] sm:$0xff]  ;;  %s2250_s11 = scalar_lea.vmem %s2310_s3, %s1650_s26 }
  0x12   : > { %v1819_v7 = vld [vmem:[%s1813_s29] sm:$0xff]  ;;  %v1822_v8 = vld [vmem:[%s1813_s29 + $0x8] sm:$0xff]  ;;  %v1825_v9 = vld [vmem:[%s1813_s29 + $0x10] sm:$0xff] }
  0x13   : > { %v1602_v10 = vpack.c.bf16 %v1822_v8, %v1819_v7  ;;  %v1830_v11 = vld [vmem:[%s1813_s29 + $0x18] sm:$0xff]  ;;  %v1838_v14 = vld [vmem:[%s1813_s29 + $0x20] sm:$0xff]  ;;  %v1841_v15 = vld [vmem:[%s1813_s29 + $0x28] sm:$0xff] }
  0x14   : > { %v1606_v13 = vpack.c.bf16 %v1830_v11, %v1825_v9  ;;  %v1610_v17 = vpack.c.bf16 %v1841_v15, %v1838_v14  ;;  %v1852_v19 = vld [vmem:[%s1813_s29 + $0x30] sm:$0xff]  ;;  %v1855_v20 = vld [vmem:[%s1813_s29 + $0x38] sm:$0xff]  ;;  %347 = vperm.xlu1 %1677, %v269_v16   ;;  %342 = vperm.xlu0 %1676, %v268_v18   ;;  %v1866_v24 = vld [vmem:[%s1813_s29 + $0x40] sm:$0xff] }
  0x15   : > { %1603 = vmatprep.subr.bf16.mxu0 %v1602_v10  ;;  %v1614_v22 = vpack.c.bf16 %v1855_v20, %v1852_v19  ;;  %v1869_v25 = vld [vmem:[%s1813_s29 + $0x48] sm:$0xff]  ;;  %v1880_v29 = vld [vmem:[%s1813_s29 + $0x50] sm:$0xff]  ;;  %v1883_v30 = vld [vmem:[%s1813_s29 + $0x58] sm:$0xff] }
  0x16   : > { %1605 = vmatpush3.bf16.msra.mxu0 %v1602_v10  ;;  %v1618_v27 = vpack.c.bf16 %v1869_v25, %v1866_v24  ;;  %v1622_v32 = vpack.c.bf16 %v1883_v30, %v1880_v29  ;;  %v287_v53 = vld [vmem:[%s2309_s2 + $0xc8] sm:$0xff]  ;;  %v225_v56 = vld [vmem:[%s2308_s1 + $0x58] sm:$0xff]  ;;  %v226_v58 = vld [vmem:[%s2308_s1 + $0x60] sm:$0xff] }
  0x17   : > { %1607 = vmatprep.subr.bf16.mxu0 %v1606_v13  ;;  %v289_v57 = vld [vmem:[%s2309_s2 + $0xd8] sm:$0xff]  ;;  %v288_v59 = vld [vmem:[%s2309_s2 + $0xd0] sm:$0xff]  ;;  %v227_v60 = vld [vmem:[%s2308_s1 + $0x68] sm:$0xff] }
  0x18   : > { %377 = vperm.xlu1 %1677, %v275_v21   ;;  %372 = vperm.xlu0 %1676, %v274_v23   ;;  %v291_v61 = vld [vmem:[%s2309_s2 + $0xe8] sm:$0xff]  ;;  %v228_v62 = vld [vmem:[%s2308_s1 + $0x70] sm:$0xff]  ;;  %v290_v63 = vld [vmem:[%s2309_s2 + $0xe0] sm:$0xff] }
  0x19   : > { %v229_v0 = vld [vmem:[%s2308_s1 + $0x78] sm:$0xff]  ;;  %v230_v2 = vld [vmem:[%s2308_s1 + $0x80] sm:$0xff]  ;;  %v292_v3 = vld [vmem:[%s2309_s2 + $0xf0] sm:$0xff] }
  0x1a   : > { %1609 = vmatpush3.bf16.msra.mxu0 %v1606_v13  ;;  %v293_v1 = vld [vmem:[%s2309_s2 + $0xf8] sm:$0xff]  ;;  %v231_v4 = vld [vmem:[%s2308_s1 + $0x88] sm:$0xff]  ;;  %v232_v6 = vld [vmem:[%s2308_s1 + $0x90] sm:$0xff] }
  0x1b   : > { %1611 = vmatprep.subr.bf16.mxu0 %v1610_v17  ;;  %v295_v5 = vld [vmem:[%s2309_s2 + $0x108] sm:$0xff]  ;;  %v294_v10 = vld [vmem:[%s2309_s2 + $0x100] sm:$0xff]  ;;  %v233_v12 = vld [vmem:[%s2308_s1 + $0x98] sm:$0xff] }
  0x1c   : > { %357 = vperm.xlu1 %1677, %v271_v26   ;;  %352 = vperm.xlu0 %1676, %v270_v28   ;;  %v297_v13 = vld [vmem:[%s2309_s2 + $0x118] sm:$0xff]  ;;  %v234_v16 = vld [vmem:[%s2308_s1 + $0xa0] sm:$0xff]  ;;  %v235_v18 = vld [vmem:[%s2308_s1 + $0xa8] sm:$0xff] }
  0x1d   : > { %v299_v21 = vld [vmem:[%s2309_s2 + $0x128] sm:$0xff]  ;;  %v298_v23 = vld [vmem:[%s2309_s2 + $0x120] sm:$0xff]  ;;  %v237_v26 = vld [vmem:[%s2308_s1 + $0xb8] sm:$0xff] }
  0x1e   : > { %1613 = vmatpush3.bf16.msra.mxu0 %v1610_v17  ;;  %v296_v17 = vld [vmem:[%s2309_s2 + $0x110] sm:$0xff] }
  0x1f   : > { %1615 = vmatprep.subr.bf16.mxu0 %v1614_v22  ;;  %v300_v28 = vld [vmem:[%s2309_s2 + $0x130] sm:$0xff] }
  0x20   : > { %387 = vperm.xlu1 %1677, %v277_v31   ;;  %382 = vperm.xlu0 %1676, %v276_v33   ;;  %v303_v31 = vld [vmem:[%s2309_s2 + $0x148] sm:$0xff]  ;;  %v305_v33 = vld [vmem:[%s2309_s2 + $0x158] sm:$0xff] }
  0x22   : > { %1617 = vmatpush3.bf16.msra.mxu0 %v1614_v22  ;;  %v236_v22 = vld [vmem:[%s2308_s1 + $0xb0] sm:$0xff] }
  0x23   : > { %1619 = vmatprep.subr.bf16.mxu0 %v1618_v27 }
  0x24   : > { %367 = vperm.xlu1 %1677, %v273_v34   ;;  %362 = vperm.xlu0 %1676, %v272_v35   ;;  %v304_v34 = vld [vmem:[%s2309_s2 + $0x150] sm:$0xff]  ;;  %v307_v35 = vld [vmem:[%s2309_s2 + $0x168] sm:$0xff] }
  0x26   : > { %1621 = vmatpush3.bf16.msra.mxu0 %v1618_v27  ;;  %v301_v27 = vld [vmem:[%s2309_s2 + $0x138] sm:$0xff] }
  0x27   : > { %1623 = vmatprep.subr.bf16.mxu0 %v1622_v32 }
  0x28   : > { %397 = vperm.xlu1 %1677, %v279_v37   ;;  %392 = vperm.xlu0 %1676, %v278_v39   ;;  %v309_v37 = vld [vmem:[%s2309_s2 + $0x178] sm:$0xff]  ;;  %v238_v39 = vld [vmem:[%s2308_s1 + $0xc0] sm:$0xff] }
  0x29   : > { %1566 = vmatprep.mubr.msk.f32.mxu1 %vm430_vm0, %v238_v39 }
  0x2a   : > { %1625 = vmatpush3.bf16.msra.mxu0 %v1622_v32  ;;  %v302_v32 = vld [vmem:[%s2309_s2 + $0x140] sm:$0xff] }
  0x2c   : > { %407 = vperm.xlu1 %1677, %v281_v41   ;;  %402 = vperm.xlu0 %1676, %v280_v43  }
  0x2d   : > { %1507 = vmatmul.mubr.msk.f32.vlgmr.msra.gmra.mrb[0].mxu0 %vm430_vm0, %v215_v36  ;;  %v306_v36 = vld [vmem:[%s2309_s2 + $0x160] sm:$0xff] }
  0x2e   : > { %1509 = vmatprep.mubr.msk.f32.mxu0 %vm430_vm0, %v216_v38  ;;  %v308_v38 = vld [vmem:[%s2309_s2 + $0x170] sm:$0xff] }
  0x30   : > { %417 = vperm.xlu1 %1677, %v283_v45   ;;  %412 = vperm.xlu0 %1676, %v282_v47  }
  0x31   : > { %1510 = vmatmul.mubr.msk.f32.gmra.mrb[2].mxu0 %vm430_vm0, %v217_v40 }
  0x32   : > { %1512 = vmatprep.mubr.msk.f32.mxu0 %vm430_vm0, %v218_v42 }
  0x34   : > { %427 = vperm.xlu1 %1677, %v285_v49   ;;  %422 = vperm.xlu0 %1676, %v284_v51  }
  0x35   : > { %1513 = vmatmul.mubr.msk.f32.gmra.mrb[4].mxu0 %vm430_vm0, %v219_v44 }
  0x36   : > { %1515 = vmatprep.mubr.msk.f32.mxu0 %vm430_vm0, %v220_v46 }
  0x38   : > { %791 = vperm.xlu1 %1677, %v287_v53   ;;  %786 = vperm.xlu0 %1676, %v286_v55  }
  0x39   : > { %1516 = vmatmul.mubr.msk.f32.gmra.mrb[6].mxu0 %vm430_vm0, %v221_v48 }
  0x3a   : > { %1518 = vmatprep.mubr.msk.f32.mxu0 %vm430_vm0, %v222_v50 }
  0x3c   : > { %801 = vperm.xlu1 %1677, %v289_v57   ;;  %796 = vperm.xlu0 %1676, %v288_v59  }
  0x3d   : > { %1519 = vmatmul.mubr.msk.f32.gmra.mrb[8].mxu0 %vm430_vm0, %v223_v52 }
  0x3e   : > { %1521 = vmatprep.mubr.msk.f32.mxu0 %vm430_vm0, %v224_v54 }
  0x40   : > { %811 = vperm.xlu1 %1677, %v291_v61   ;;  %806 = vperm.xlu0 %1676, %v290_v63  }
  0x41   : > { %1522 = vmatmul.mubr.msk.f32.gmra.mrb[10].mxu0 %vm430_vm0, %v225_v56 }
  0x42   : > { %1524 = vmatprep.mubr.msk.f32.mxu0 %vm430_vm0, %v226_v58 }
  0x44   : > { %821 = vperm.xlu1 %1677, %v293_v1   ;;  %816 = vperm.xlu0 %1676, %v292_v3  }
  0x45   : > { %1525 = vmatmul.mubr.msk.f32.gmra.mrb[12].mxu0 %vm430_vm0, %v227_v60 }
  0x46   : > { %1527 = vmatprep.mubr.msk.f32.mxu0 %vm430_vm0, %v228_v62 }
  0x48   : > { %831 = vperm.xlu1 %1677, %v295_v5   ;;  %826 = vperm.xlu0 %1676, %v294_v10  }
  0x49   : > { %1528 = vmatmul.mubr.msk.f32.gmra.mrb[14].mxu0 %vm430_vm0, %v229_v0 }
  0x4a   : > { %1530 = vmatprep.mubr.msk.f32.mxu0 %vm430_vm0, %v230_v2 }
  0x4c   : > { %841 = vperm.xlu1 %1677, %v297_v13   ;;  %836 = vperm.xlu0 %1676, %v296_v17  }
  0x4d   : > { %1531 = vmatmul.mubr.msk.f32.gmra.mrb[16].mxu0 %vm430_vm0, %v231_v4 }
  0x4e   : > { %1533 = vmatprep.mubr.msk.f32.mxu0 %vm430_vm0, %v232_v6 }
  0x50   : > { %851 = vperm.xlu1 %1677, %v299_v21   ;;  %846 = vperm.xlu0 %1676, %v298_v23  }
  0x51   : > { %1534 = vmatmul.mubr.msk.f32.gmra.mrb[18].mxu0 %vm430_vm0, %v233_v12 }
  0x52   : > { %1536 = vmatprep.mubr.msk.f32.mxu0 %vm430_vm0, %v234_v16 }
  0x54   : > { %861 = vperm.xlu1 %1677, %v301_v27   ;;  %856 = vperm.xlu0 %1676, %v300_v28  }
  0x55   : > { %1537 = vmatmul.mubr.msk.f32.gmra.mrb[20].mxu0 %vm430_vm0, %v235_v18 }
  0x56   : > { %1539 = vmatprep.mubr.msk.f32.mxu0 %vm430_vm0, %v236_v22 }
  0x58   : > { %871 = vperm.xlu1 %1677, %v303_v31   ;;  %866 = vperm.xlu0 %1676, %v302_v32  }
  0x59   : > { %1540 = vmatmul.mubr.msk.f32.gmra.mrb[22].mxu0 %vm430_vm0, %v237_v26 }
  0x5c   : > { %881 = vperm.xlu1 %1677, %v305_v33   ;;  %876 = vperm.xlu0 %1676, %v304_v34  }
  0x60   : > { %891 = vperm.xlu1 %1677, %v307_v35   ;;  %886 = vperm.xlu0 %1676, %v306_v36  }
  0x64   : > { %901 = vperm.xlu1 %1677, %v309_v37   ;;  %896 = vperm.xlu0 %1676, %v308_v38  }
  0x87   : > { %v323_v40 = vpop.permute.xlu1 %322  ;;  %v313_v41 = vpop.permute.xlu0 %312 }
  0x8b   : > { %v328_v42 = vpop.permute.xlu1 %327  ;;  %v318_v43 = vpop.permute.xlu0 %317 }
  0x8f   : > { %v338_v44 = vpop.permute.xlu1 %337  ;;  %v333_v45 = vpop.permute.xlu0 %332 }
  0x93   : > { %v348_v46 = vpop.permute.xlu1 %347  ;;  %v343_v47 = vpop.permute.xlu0 %342 }
  0x97   : > { %v378_v50 = vpop.permute.xlu1 %377  ;;  %v373_v51 = vpop.permute.xlu0 %372 }
  0x9b   : > { %v358_v57 = vpop.permute.xlu1 %357  ;;  %v353_v60 = vpop.permute.xlu0 %352 }
  0x9f   : > { %v388_v6 = vpop.permute.xlu1 %387  ;;  %v383_v12 = vpop.permute.xlu0 %382 }
  0xa3   : > { %v368_v26 = vpop.permute.xlu1 %367  ;;  %v363_v31 = vpop.permute.xlu0 %362 }
 0x100   : > { %v1508_v48 = vpop.f32.mrb[0].mxu0 }
 0x101   : > { %v569_v49 = vpop.f32.mrb[1].mxu0  ;;  %v575_v52 = vadd.f32 %v1508_v48, %v318_v43 }
 0x102   : > { %v570_v54 = vadd.f32 %v569_v49, %v313_v41  ;;  %v393_v49 = vpop.permute.xlu0 %392 }
 0x103   : > { %v689_v58 = vmul.f32 0.5, %v575_v52 }
 0x104   : > { %v1511_v53 = vpop.f32.mrb[2].mxu0  ;;  %v688_v61 = vmul.f32 0.5, %v570_v54 }
 0x105   : > { %v579_v55 = vpop.f32.mrb[3].mxu0  ;;  %v585_v56 = vadd.f32 %v1511_v53, %v328_v42  ;;  %1678 = vtanh.f32 %v689_v58 }
 0x106   : > { %v580_v62 = vadd.f32 %v579_v55, %v323_v40  ;;  %1680 = vtanh.f32 %v688_v61 }
 0x107   : > { %v691_v0 = vmul.f32 0.5, %v585_v56 }
 0x108   : > { %v1514_v59 = vpop.f32.mrb[4].mxu0  ;;  %v690_v4 = vmul.f32 0.5, %v580_v62 }
 0x109   : > { %v589_v63 = vpop.f32.mrb[5].mxu0  ;;  %v595_v1 = vadd.f32 %v1514_v59, %v338_v44  ;;  %1682 = vtanh.f32 %v691_v0 }
 0x10a   : > { %v590_v2 = vadd.f32 %v589_v63, %v333_v45  ;;  %1684 = vtanh.f32 %v690_v4  ;;  %v398_v45 = vpop.permute.xlu1 %397 }
 0x10b   : > { %v693_v10 = vmul.f32 0.5, %v595_v1 }
 0x10c   : > { %v1517_v3 = vpop.f32.mrb[6].mxu0  ;;  %v692_v13 = vmul.f32 0.5, %v590_v2 }
 0x10d   : > { %v599_v5 = vpop.f32.mrb[7].mxu0  ;;  %v605_v16 = vadd.f32 %v1517_v3, %v348_v46  ;;  %1686 = vtanh.f32 %v693_v10 }
 0x10e   : > { %v600_v18 = vadd.f32 %v599_v5, %v343_v47  ;;  %1688 = vtanh.f32 %v692_v13  ;;  %v408_v10 = vpop.permute.xlu1 %407 }
 0x10f   : > { %v695_v27 = vmul.f32 0.5, %v605_v16  ;;  %v1679_v34 = vpop.eup %1678 }
 0x110   : > { %v1520_v17 = vpop.f32.mrb[8].mxu0  ;;  %v694_v32 = vmul.f32 0.5, %v600_v18  ;;  %v1681_v36 = vpop.eup %1680  ;;  %v713_v41 = vmul.f32 0.5, %v1679_v34 }
 0x111   : > { %v609_v21 = vpop.f32.mrb[9].mxu0  ;;  %v615_v22 = vadd.f32 %v1520_v17, %v358_v57  ;;  %1690 = vtanh.f32 %v695_v27  ;;  %v712_v46 = vmul.f32 0.5, %v1681_v36 }
 0x112   : > { %v610_v23 = vadd.f32 %v609_v21, %v353_v60  ;;  %1692 = vtanh.f32 %v694_v32  ;;  %v725_v59 = vadd.f32 0.5, %v713_v41  ;;  %v403_v21 = vpop.permute.xlu0 %402 }
 0x113   : > { %v697_v35 = vmul.f32 0.5, %v615_v22  ;;  %v1683_v38 = vpop.eup %1682  ;;  %v724_v63 = vadd.f32 0.5, %v712_v46 }
 0x114   : > { %v1523_v28 = vpop.f32.mrb[10].mxu0  ;;  %v696_v37 = vmul.f32 0.5, %v610_v23  ;;  %v1685_v48 = vpop.eup %1684  ;;  %v715_v52 = vmul.f32 0.5, %v1683_v38 }
 0x115   : > { %v619_v33 = vpop.f32.mrb[11].mxu0  ;;  %v625_v39 = vadd.f32 %v1523_v28, %v368_v26  ;;  %1694 = vtanh.f32 %v697_v35  ;;  %v714_v0 = vmul.f32 0.5, %v1685_v48 }
 0x116   : > { %v620_v42 = vadd.f32 %v619_v33, %v363_v31  ;;  %1696 = vtanh.f32 %v696_v37  ;;  %v727_v2 = vadd.f32 0.5, %v715_v52 }
 0x117   : > { %v1687_v54 = vpop.eup %1686  ;;  %v699_v55 = vmul.f32 0.5, %v625_v39  ;;  %v726_v27 = vadd.f32 0.5, %v714_v0 }
 0x118   : > { %v1526_v40 = vpop.f32.mrb[12].mxu0  ;;  %v1689_v58 = vpop.eup %1688  ;;  %v698_v60 = vmul.f32 0.5, %v620_v42  ;;  %v717_v3 = vmul.f32 0.5, %v1687_v54 }
 0x119   : > { %v635_v43 = vadd.f32 %v1526_v40, %v378_v50  ;;  %v629_v44 = vpop.f32.mrb[13].mxu0  ;;  %v716_v13 = vmul.f32 0.5, %v1689_v58  ;;  %1698 = vtanh.f32 %v699_v55  ;;  %v413_v54 = vpop.permute.xlu0 %412 }
 0x11a   : > { %v630_v47 = vadd.f32 %v629_v44, %v373_v51  ;;  %1700 = vtanh.f32 %v698_v60  ;;  %v729_v34 = vadd.f32 0.5, %v717_v3 }
 0x11b   : > { %v737_v53 = vmax.f32 %v635_v43, 0.0  ;;  %v728_v38 = vadd.f32 0.5, %v716_v13 }
 0x11c   : > { %v736_v56 = vmax.f32 %v630_v47, 0.0  ;;  %v1529_v57 = vpop.f32.mrb[14].mxu0  ;;  %v418_v47 = vpop.permute.xlu1 %417 }
 0x11d   : > { %v749_v61 = vsub.f32 %v737_v53, %v1822_v8  ;;  %v645_v50 = vadd.f32 %v1529_v57, %v388_v6  ;;  %v639_v62 = vpop.f32.mrb[15].mxu0 }
 0x11e   : > { %v748_v51 = vsub.f32 %v736_v56, %v1819_v7  ;;  %v640_v1 = vadd.f32 %v639_v62, %v383_v12  ;;  %v1691_v12 = vpop.eup %1690 }
 0x11f   : > { %v761_v4 = vmul.f32 %v749_v61, %v725_v59  ;;  %v739_v5 = vmax.f32 %v645_v50, 0.0  ;;  %v1693_v33 = vpop.eup %1692  ;;  %v719_v43 = vmul.f32 0.5, %v1691_v12 }
 0x120   : > { %v760_v16 = vmul.f32 %v748_v51, %v724_v63  ;;  %v738_v17 = vmax.f32 %v640_v1, 0.0  ;;  %v1532_v18 = vpop.f32.mrb[16].mxu0  ;;  %v1695_v37 = vpop.eup %1694  ;;  %v718_v48 = vmul.f32 0.5, %v1693_v33 }
 0x121   : > { %v751_v6 = vsub.f32 %v739_v5, %v1830_v11  ;;  %v655_v22 = vadd.f32 %v1532_v18, %v398_v45  ;;  %v649_v23 = vpop.f32.mrb[17].mxu0  ;;  %v2095_v26 = vadd.f32 %v761_v4, %v1822_v8  ;;  %v1697_v42 = vpop.eup %1696  ;;  %v721_v55 = vmul.f32 0.5, %v1695_v37 }
 0x122   : > { %v750_v28 = vsub.f32 %v738_v17, %v1825_v9  ;;  %v650_v31 = vadd.f32 %v649_v23, %v393_v49  ;;  %v2099_v32 = vadd.f32 %v760_v16, %v1819_v7  ;;  %v731_v50 = vadd.f32 0.5, %v719_v43  ;;  %v423_v23 = vpop.permute.xlu0 %422 }
 0x123   : > { %v763_v35 = vmul.f32 %v751_v6, %v727_v2  ;;  %v741_v36 = vmax.f32 %v655_v22, 0.0  ;;  %v1699_v51 = vpop.eup %1698  ;;  %v730_v1 = vadd.f32 0.5, %v718_v48 }
 0x124   : > { %v762_v39 = vmul.f32 %v750_v28, %v726_v27  ;;  %v740_v40 = vmax.f32 %v650_v31, 0.0  ;;  %v1535_v41 = vpop.f32.mrb[18].mxu0  ;;  %v1626_v8 = vpack.c.bf16 %v2095_v26, %v2099_v32  ;;  %v1701_v5 = vpop.eup %1700 }
 0x125   : > { %v2104_v44 = vadd.f32 %v763_v35, %v1830_v11  ;;  %v753_v7 = vsub.f32 %v741_v36, %v1841_v15  ;;  %v665_v45 = vadd.f32 %v1535_v41, %v408_v10  ;;  %v659_v46 = vpop.f32.mrb[19].mxu0  ;;  %v720_v11 = vmul.f32 0.5, %v1697_v42 }
 0x126   : > { %v2108_v49 = vadd.f32 %v762_v39, %v1825_v9  ;;  %v752_v52 = vsub.f32 %v740_v40, %v1838_v14  ;;  %v660_v53 = vadd.f32 %v659_v46, %v403_v21  ;;  %1627 = vmatprep.subr.bf16.mxu1 %v1626_v8  ;;  %v733_v10 = vadd.f32 0.5, %v721_v55  ;;  %v244_v55 = vld [vmem:[%s2308_s1 + $0xf0] sm:$0xff] }
 0x127   : > { %v765_v56 = vmul.f32 %v753_v7, %v729_v34  ;;  %v743_v57 = vmax.f32 %v665_v45, 0.0  ;;  %1629 = vmatpush3.bf16.msra.mxu1 %v1626_v8  ;;  %v732_v17 = vadd.f32 0.5, %v720_v11  ;;  %v722_v33 = vmul.f32 0.5, %v1701_v5  ;;  %v247_v11 = vld [vmem:[%s2308_s1 + $0x108] sm:$0xff]  ;;  %v260_v5 = vld [vmem:[%s2308_s1 + $0x170] sm:$0xff] }
 0x128   : > { %v764_v58 = vmul.f32 %v752_v52, %v728_v38  ;;  %v742_v59 = vmax.f32 %v660_v53, 0.0  ;;  %v1538_v60 = vpop.f32.mrb[20].mxu0  ;;  %v1630_v61 = vpack.c.bf16 %v2104_v44, %v2108_v49  ;;  %v239_v52 = vld [vmem:[%s2308_s1 + $0xc8] sm:$0xff]  ;;  %v240_v53 = vld [vmem:[%s2308_s1 + $0xd0] sm:$0xff] }
 0x129   : > { %v2114_v9 = vadd.f32 %v765_v56, %v1841_v15  ;;  %v755_v62 = vsub.f32 %v743_v57, %v1855_v20  ;;  %v675_v63 = vadd.f32 %v1538_v60, %v418_v47  ;;  %v669_v0 = vpop.f32.mrb[21].mxu0  ;;  %v428_v15 = vpop.permute.xlu1 %427  ;;  %v245_v56 = vld [vmem:[%s2308_s1 + $0xf8] sm:$0xff]  ;;  %v246_v57 = vld [vmem:[%s2308_s1 + $0x100] sm:$0xff] }
 0x12a   : > { %v2118_v2 = vadd.f32 %v764_v58, %v1838_v14  ;;  %v754_v3 = vsub.f32 %v742_v59, %v1852_v19  ;;  %v670_v4 = vadd.f32 %v669_v0, %v413_v54  ;;  %1631 = vmatprep.subr.bf16.mxu1 %v1630_v61  ;;  %v723_v14 = vmul.f32 0.5, %v1699_v51  ;;  %v243_v54 = vld [vmem:[%s2308_s1 + $0xe8] sm:$0xff]  ;;  %v248_v58 = vld [vmem:[%s2308_s1 + $0x110] sm:$0xff]  ;;  %v249_v59 = vld [vmem:[%s2308_s1 + $0x118] sm:$0xff] }
 0x12b   : > { %v767_v13 = vmul.f32 %v755_v62, %v731_v50  ;;  %v745_v16 = vmax.f32 %v675_v63, 0.0  ;;  %1633 = vmatpush3.bf16.msra.mxu1 %v1630_v61  ;;  %v250_v60 = vld [vmem:[%s2308_s1 + $0x120] sm:$0xff]  ;;  %v251_v61 = vld [vmem:[%s2308_s1 + $0x128] sm:$0xff]  ;;  %v252_v50 = vld [vmem:[%s2308_s1 + $0x130] sm:$0xff] }
 0x12c   : > { %v766_v18 = vmul.f32 %v754_v3, %v730_v1  ;;  %v744_v21 = vmax.f32 %v670_v4, 0.0  ;;  %v1541_v6 = vpop.f32.mrb[22].mxu0  ;;  %v1634_v22 = vpack.c.bf16 %v2114_v9, %v2118_v2  ;;  %v735_v41 = vadd.f32 0.5, %v723_v14  ;;  %v253_v62 = vld [vmem:[%s2308_s1 + $0x138] sm:$0xff]  ;;  %v254_v63 = vld [vmem:[%s2308_s1 + $0x140] sm:$0xff]  ;;  %v255_v0 = vld [vmem:[%s2308_s1 + $0x148] sm:$0xff] }
 0x12d   : > { %v2124_v12 = vadd.f32 %v767_v13, %v1855_v20  ;;  %v757_v27 = vsub.f32 %v745_v16, %v1869_v25  ;;  %v685_v28 = vadd.f32 %v1541_v6, %v428_v15  ;;  %v679_v31 = vpop.f32.mrb[23].mxu0  ;;  %v256_v51 = vld [vmem:[%s2308_s1 + $0x150] sm:$0xff]  ;;  %v257_v1 = vld [vmem:[%s2308_s1 + $0x158] sm:$0xff]  ;;  %v258_v3 = vld [vmem:[%s2308_s1 + $0x160] sm:$0xff]  ;;  %v792_v13 = vpop.permute.xlu1 %791 }
 0x12e   : > { %v2128_v34 = vadd.f32 %v766_v18, %v1852_v19  ;;  %v756_v35 = vsub.f32 %v744_v21, %v1866_v24  ;;  %v680_v36 = vadd.f32 %v679_v31, %v423_v23  ;;  %1635 = vmatprep.subr.bf16.mxu1 %v1634_v22  ;;  %v734_v19 = vadd.f32 0.5, %v722_v33  ;;  %v259_v4 = vld [vmem:[%s2308_s1 + $0x168] sm:$0xff]  ;;  %v787_v16 = vpop.permute.xlu0 %786 }
 0x12f   : > { %v769_v37 = vmul.f32 %v757_v27, %v733_v10  ;;  %v747_v38 = vmax.f32 %v685_v28, 0.0  ;;  %1637 = vmatpush3.bf16.msra.mxu1 %v1634_v22  ;;  %v261_v10 = vld [vmem:[%s2308_s1 + $0x178] sm:$0xff] }
 0x130   : > { %v768_v39 = vmul.f32 %v756_v35, %v732_v17  ;;  %v746_v40 = vmax.f32 %v680_v36, 0.0  ;;  %v1638_v20 = vpack.c.bf16 %v2124_v12, %v2128_v34 }
 0x131   : > { %v2134_v8 = vadd.f32 %v769_v37, %v1869_v25  ;;  %v759_v42 = vsub.f32 %v747_v38, %v1883_v30  ;;  %v802_v15 = vpop.permute.xlu1 %801 }
 0x132   : > { %v2138_v43 = vadd.f32 %v768_v39, %v1866_v24  ;;  %v758_v7 = vsub.f32 %v746_v40, %v1880_v29  ;;  %1639 = vmatprep.subr.bf16.mxu1 %v1638_v20  ;;  %v797_v17 = vpop.permute.xlu0 %796 }
 0x133   : > { %v771_v45 = vmul.f32 %v759_v42, %v735_v41  ;;  %1641 = vmatpush3.bf16.msra.mxu1 %v1638_v20 }
 0x134   : > { %v770_v46 = vmul.f32 %v758_v7, %v734_v19  ;;  %v1642_v47 = vpack.c.bf16 %v2134_v8, %v2138_v43 }
 0x135   : > { %v2144_v48 = vadd.f32 %v771_v45, %v1883_v30  ;;  %v242_v30 = vld [vmem:[%s2308_s1 + $0xe0] sm:$0xff]  ;;  %v812_v18 = vpop.permute.xlu1 %811 }
 0x136   : > { %v2147_v25 = vadd.f32 %v770_v46, %v1880_v29  ;;  %1643 = vmatprep.subr.bf16.mxu1 %v1642_v47  ;;  %v241_v29 = vld [vmem:[%s2308_s1 + $0xd8] sm:$0xff]  ;;  %v807_v21 = vpop.permute.xlu0 %806 }
 0x137   : > { %1645 = vmatpush3.bf16.msra.mxu1 %v1642_v47 }
 0x138   : > { %v1646_v24 = vpack.c.bf16 %v2144_v48, %v2147_v25 }
 0x139   : > { %v822_v6 = vpop.permute.xlu1 %821 }
 0x13a   : > { %1647 = vmatprep.subr.bf16.mxu1 %v1646_v24  ;;  %v817_v22 = vpop.permute.xlu0 %816 }
 0x13b   : > { %1649 = vmatpush3.bf16.msra.mxu1 %v1646_v24 }
 0x13d   : > { %v832_v27 = vpop.permute.xlu1 %831 }
 0x13e   : > { %1567 = vmatmul.mubr.msk.f32.vlgmr.msra.gmra.mrb[0].mxu1 %vm430_vm0, %v239_v52  ;;  %v827_v28 = vpop.permute.xlu0 %826 }
 0x13f   : > { %1569 = vmatprep.mubr.msk.f32.mxu1 %vm430_vm0, %v240_v53 }
 0x141   : > { %v842_v38 = vpop.permute.xlu1 %841 }
 0x142   : > { %1570 = vmatmul.mubr.msk.f32.gmra.mrb[2].mxu1 %vm430_vm0, %v241_v29  ;;  %v837_v20 = vpop.permute.xlu0 %836 }
 0x143   : > { %1572 = vmatprep.mubr.msk.f32.mxu1 %vm430_vm0, %v242_v30 }
 0x145   : > { %v852_v53 = vpop.permute.xlu1 %851 }
 0x146   : > { %1573 = vmatmul.mubr.msk.f32.gmra.mrb[4].mxu1 %vm430_vm0, %v243_v54  ;;  %v847_v30 = vpop.permute.xlu0 %846 }
 0x147   : > { %1575 = vmatprep.mubr.msk.f32.mxu1 %vm430_vm0, %v244_v55 }
 0x14a   : > { %1576 = vmatmul.mubr.msk.f32.gmra.mrb[6].mxu1 %vm430_vm0, %v245_v56 }
 0x14b   : > { %1578 = vmatprep.mubr.msk.f32.mxu1 %vm430_vm0, %v246_v57 }
 0x14e   : > { %1579 = vmatmul.mubr.msk.f32.gmra.mrb[8].mxu1 %vm430_vm0, %v247_v11 }
 0x14f   : > { %1581 = vmatprep.mubr.msk.f32.mxu1 %vm430_vm0, %v248_v58 }
 0x152   : > { %1582 = vmatmul.mubr.msk.f32.gmra.mrb[10].mxu1 %vm430_vm0, %v249_v59 }
 0x153   : > { %1584 = vmatprep.mubr.msk.f32.mxu1 %vm430_vm0, %v250_v60  ;;  %v862_v60 = vpop.permute.xlu1 %861 }
 0x156   : > { %1585 = vmatmul.mubr.msk.f32.gmra.mrb[12].mxu1 %vm430_vm0, %v251_v61 }
 0x157   : > { %1587 = vmatprep.mubr.msk.f32.mxu1 %vm430_vm0, %v252_v50 }
 0x15a   : > { %1588 = vmatmul.mubr.msk.f32.gmra.mrb[14].mxu1 %vm430_vm0, %v253_v62  ;;  %v857_v62 = vpop.permute.xlu0 %856 }
 0x15b   : > { %1590 = vmatprep.mubr.msk.f32.mxu1 %vm430_vm0, %v254_v63 }
 0x15e   : > { %1591 = vmatmul.mubr.msk.f32.gmra.mrb[16].mxu1 %vm430_vm0, %v255_v0 }
 0x15f   : > { %1593 = vmatprep.mubr.msk.f32.mxu1 %vm430_vm0, %v256_v51 }
 0x162   : > { %1594 = vmatmul.mubr.msk.f32.gmra.mrb[18].mxu1 %vm430_vm0, %v257_v1 }
 0x163   : > { %1596 = vmatprep.mubr.msk.f32.mxu1 %vm430_vm0, %v258_v3 }
 0x166   : > { %1597 = vmatmul.mubr.msk.f32.gmra.mrb[20].mxu1 %vm430_vm0, %v259_v4 }
 0x167   : > { %1599 = vmatprep.mubr.msk.f32.mxu1 %vm430_vm0, %v260_v5 }
 0x16a   : > { %1600 = vmatmul.mubr.msk.f32.gmra.mrb[22].mxu1 %vm430_vm0, %v261_v10 }
 0x211   : > { %v1568_v23 = vpop.f32.mrb[0].mxu1 }
 0x212   : > { %v1042_v14 = vpop.f32.mrb[1].mxu1  ;;  %v1048_v31 = vadd.f32 %v1568_v23, %v792_v13 }
 0x213   : > { %v1043_v35 = vadd.f32 %v1042_v14, %v787_v16  ;;  %v867_v14 = vpop.permute.xlu0 %866 }
 0x214   : > { %v1162_v39 = vmul.f32 0.5, %v1048_v31 }
 0x215   : > { %v1571_v33 = vpop.f32.mrb[2].mxu1  ;;  %v1161_v41 = vmul.f32 0.5, %v1043_v35 }
 0x216   : > { %v1052_v36 = vpop.f32.mrb[3].mxu1  ;;  %v1058_v37 = vadd.f32 %v1571_v33, %v802_v15  ;;  %1702 = vtanh.f32 %v1162_v39 }
 0x217   : > { %v1053_v42 = vadd.f32 %v1052_v36, %v797_v17  ;;  %1704 = vtanh.f32 %v1161_v41 }
 0x218   : > { %v1164_v7 = vmul.f32 0.5, %v1058_v37 }
 0x219   : > { %v1574_v40 = vpop.f32.mrb[4].mxu1  ;;  %v1163_v24 = vmul.f32 0.5, %v1053_v42 }
 0x21a   : > { %v1062_v19 = vpop.f32.mrb[5].mxu1  ;;  %v1068_v45 = vadd.f32 %v1574_v40, %v812_v18  ;;  %1706 = vtanh.f32 %v1164_v7 }
 0x21b   : > { %v1063_v46 = vadd.f32 %v1062_v19, %v807_v21  ;;  %1708 = vtanh.f32 %v1163_v24  ;;  %v872_v21 = vpop.permute.xlu1 %871 }
 0x21c   : > { %v1166_v29 = vmul.f32 0.5, %v1068_v45 }
 0x21d   : > { %v1577_v47 = vpop.f32.mrb[6].mxu1  ;;  %v1165_v54 = vmul.f32 0.5, %v1063_v46 }
 0x21e   : > { %v1072_v52 = vpop.f32.mrb[7].mxu1  ;;  %v1078_v55 = vadd.f32 %v1577_v47, %v822_v6  ;;  %1710 = vtanh.f32 %v1166_v29 }
 0x21f   : > { %v1073_v57 = vadd.f32 %v1072_v52, %v817_v22  ;;  %1712 = vtanh.f32 %v1165_v54 }
 0x220   : > { %v1168_v61 = vmul.f32 0.5, %v1078_v55  ;;  %v1703_v51 = vpop.eup %1702 }
 0x221   : > { %v1580_v56 = vpop.f32.mrb[8].mxu1  ;;  %v1167_v63 = vmul.f32 0.5, %v1073_v57  ;;  %v1705_v3 = vpop.eup %1704  ;;  %v1186_v16 = vmul.f32 0.5, %v1703_v51 }
 0x222   : > { %v1082_v11 = vpop.f32.mrb[9].mxu1  ;;  %v1088_v58 = vadd.f32 %v1580_v56, %v832_v27  ;;  %1714 = vtanh.f32 %v1168_v61  ;;  %v1185_v6 = vmul.f32 0.5, %v1705_v3  ;;  %v877_v56 = vpop.permute.xlu0 %876 }
 0x223   : > { %v1083_v59 = vadd.f32 %v1082_v11, %v827_v28  ;;  %1716 = vtanh.f32 %v1167_v63 }
 0x224   : > { %v1170_v1 = vmul.f32 0.5, %v1088_v58  ;;  %v1707_v5 = vpop.eup %1706  ;;  %v1197_v42 = vadd.f32 0.5, %v1185_v6 }
 0x225   : > { %v1583_v50 = vpop.f32.mrb[10].mxu1  ;;  %v1169_v4 = vmul.f32 0.5, %v1083_v59  ;;  %v1709_v23 = vpop.eup %1708  ;;  %v1188_v27 = vmul.f32 0.5, %v1707_v5 }
 0x226   : > { %v1092_v0 = vpop.f32.mrb[11].mxu1  ;;  %v1098_v10 = vadd.f32 %v1583_v50, %v842_v38  ;;  %1718 = vtanh.f32 %v1170_v1  ;;  %v1198_v38 = vadd.f32 0.5, %v1186_v16  ;;  %v1187_v19 = vmul.f32 0.5, %v1709_v23 }
 0x227   : > { %v1093_v15 = vadd.f32 %v1092_v0, %v837_v20  ;;  %1720 = vtanh.f32 %v1169_v4  ;;  %v1200_v46 = vadd.f32 0.5, %v1188_v27 }
 0x228   : > { %v1711_v31 = vpop.eup %1710  ;;  %v1172_v33 = vmul.f32 0.5, %v1098_v10  ;;  %v1199_v61 = vadd.f32 0.5, %v1187_v19 }
 0x229   : > { %v1586_v13 = vpop.f32.mrb[12].mxu1  ;;  %v1713_v37 = vpop.eup %1712  ;;  %v1171_v39 = vmul.f32 0.5, %v1093_v15  ;;  %v1190_v47 = vmul.f32 0.5, %v1711_v31 }
 0x22a   : > { %v1108_v17 = vadd.f32 %v1586_v13, %v852_v53  ;;  %v1102_v18 = vpop.f32.mrb[13].mxu1  ;;  %v882_v53 = vpop.permute.xlu1 %881  ;;  %v1189_v29 = vmul.f32 0.5, %v1713_v37  ;;  %1722 = vtanh.f32 %v1172_v33 }
 0x22b   : > { %v1103_v22 = vadd.f32 %v1102_v18, %v847_v30  ;;  %1724 = vtanh.f32 %v1171_v39  ;;  %v1202_v4 = vadd.f32 0.5, %v1190_v47 }
 0x22c   : > { %v1210_v28 = vmax.f32 %v1108_v17, 0.0 }
 0x22d   : > { %v1209_v35 = vmax.f32 %v1103_v22, 0.0  ;;  %v1589_v36 = vpop.f32.mrb[14].mxu1 }
 0x22e   : > { %v1222_v40 = vsub.f32 %v1210_v28, %v2095_v26  ;;  %v1118_v20 = vadd.f32 %v1589_v36, %v862_v60  ;;  %v1112_v41 = vpop.f32.mrb[15].mxu1  ;;  %v1715_v60 = vpop.eup %1714 }
 0x22f   : > { %v1221_v7 = vsub.f32 %v1209_v35, %v2099_v32  ;;  %v1113_v45 = vadd.f32 %v1112_v41, %v857_v62  ;;  %v1717_v0 = vpop.eup %1716  ;;  %v1192_v15 = vmul.f32 0.5, %v1715_v60  ;;  %v892_v6 = vpop.permute.xlu1 %891 }
 0x230   : > { %v1234_v24 = vmul.f32 %v1222_v40, %v1198_v38  ;;  %v1212_v52 = vmax.f32 %v1118_v20, 0.0  ;;  %v1719_v3 = vpop.eup %1718  ;;  %v1191_v22 = vmul.f32 0.5, %v1717_v0  ;;  %v887_v28 = vpop.permute.xlu0 %886 }
 0x231   : > { %v1233_v30 = vmul.f32 %v1221_v7, %v1197_v42  ;;  %v1211_v54 = vmax.f32 %v1113_v45, 0.0  ;;  %v1592_v55 = vpop.f32.mrb[16].mxu1  ;;  %v1721_v16 = vpop.eup %1720  ;;  %v1194_v35 = vmul.f32 0.5, %v1719_v3  ;;  %v1204_v39 = vadd.f32 0.5, %v1192_v15 }
 0x232   : > { %v1246_v57 = vadd.f32 %v1234_v24, %v2095_v26  ;;  %v1224_v11 = vsub.f32 %v1212_v52, %v2104_v44  ;;  %v1128_v58 = vadd.f32 %v1592_v55, %v872_v21  ;;  %v1122_v59 = vpop.f32.mrb[17].mxu1  ;;  %v1201_v26 = vadd.f32 0.5, %v1189_v29 }
 0x233   : > { %v1245_v50 = vadd.f32 %v1233_v30, %v2099_v32  ;;  %v1223_v62 = vsub.f32 %v1211_v54, %v2108_v49  ;;  %v1123_v63 = vadd.f32 %v1122_v59, %v867_v14  ;;  %v1193_v36 = vmul.f32 0.5, %v1721_v16 }
 0x234   : > { %1259 = vst.msk [vmem:[%s2250_s11 + $0x8] sm:$0xff] %vm1257_vm1, %v1246_v57  ;;  %v1236_v51 = vmul.f32 %v1224_v11, %v1200_v46  ;;  %v1214_v1 = vmax.f32 %v1128_v58, 0.0  ;;  %v1723_v42 = vpop.eup %1722  ;;  %v1203_v19 = vadd.f32 0.5, %v1191_v22  ;;  %v1206_v29 = vadd.f32 0.5, %v1194_v35 }
 0x235   : > { %1258 = vst.msk [vmem:[%s2250_s11] sm:$0xff] %vm1257_vm1, %v1245_v50  ;;  %v1235_v5 = vmul.f32 %v1223_v62, %v1199_v61  ;;  %v1213_v10 = vmax.f32 %v1123_v63, 0.0  ;;  %v1595_v13 = vpop.f32.mrb[18].mxu1  ;;  %v1725_v47 = vpop.eup %1724 }
 0x236   : > { %v1248_v32 = vadd.f32 %v1236_v51, %v2104_v44  ;;  %v1226_v17 = vsub.f32 %v1214_v1, %v2114_v9  ;;  %v1138_v18 = vadd.f32 %v1595_v13, %v882_v53  ;;  %v1132_v21 = vpop.f32.mrb[19].mxu1  ;;  %v902_v53 = vpop.permute.xlu1 %901  ;;  %v1195_v60 = vmul.f32 0.5, %v1725_v47 }
 0x237   : > { %v1247_v23 = vadd.f32 %v1235_v5, %v2108_v49  ;;  %v1225_v14 = vsub.f32 %v1213_v10, %v2118_v2  ;;  %v1133_v27 = vadd.f32 %v1132_v21, %v877_v56  ;;  %v897_v56 = vpop.permute.xlu0 %896 }
 0x238   : > { %1261 = vst.msk [vmem:[%s2250_s11 + $0x18] sm:$0xff] %vm1257_vm1, %v1248_v32  ;;  %v1238_v31 = vmul.f32 %v1226_v17, %v1202_v4  ;;  %v1216_v33 = vmax.f32 %v1138_v18, 0.0 }
 0x239   : > { %1260 = vst.msk [vmem:[%s2250_s11 + $0x10] sm:$0xff] %vm1257_vm1, %v1247_v23  ;;  %v1237_v44 = vmul.f32 %v1225_v14, %v1201_v26  ;;  %v1215_v37 = vmax.f32 %v1133_v27, 0.0  ;;  %v1598_v38 = vpop.f32.mrb[20].mxu1 }
 0x23a   : > { %v1250_v40 = vadd.f32 %v1238_v31, %v2114_v9  ;;  %v1228_v49 = vsub.f32 %v1216_v33, %v2124_v12  ;;  %v1148_v20 = vadd.f32 %v1598_v38, %v892_v6  ;;  %v1142_v41 = vpop.f32.mrb[21].mxu1  ;;  %v1205_v9 = vadd.f32 0.5, %v1193_v36 }
 0x23b   : > { %v1249_v7 = vadd.f32 %v1237_v44, %v2118_v2  ;;  %v1227_v45 = vsub.f32 %v1215_v37, %v2128_v34  ;;  %v1143_v46 = vadd.f32 %v1142_v41, %v887_v28  ;;  %v1196_v2 = vmul.f32 0.5, %v1723_v42 }
 0x23c   : > { %1263 = vst.msk [vmem:[%s2250_s11 + $0x28] sm:$0xff] %vm1257_vm1, %v1250_v40  ;;  %v1240_v24 = vmul.f32 %v1228_v49, %v1204_v39  ;;  %v1218_v52 = vmax.f32 %v1148_v20, 0.0 }
 0x23d   : > { %1262 = vst.msk [vmem:[%s2250_s11 + $0x20] sm:$0xff] %vm1257_vm1, %v1249_v7  ;;  %v1239_v30 = vmul.f32 %v1227_v45, %v1203_v19  ;;  %v1217_v54 = vmax.f32 %v1143_v46, 0.0  ;;  %v1601_v55 = vpop.f32.mrb[22].mxu1  ;;  %v1208_v1 = vadd.f32 0.5, %v1196_v2 }
 0x23e   : > { %v1252_v57 = vadd.f32 %v1240_v24, %v2124_v12  ;;  %v1230_v11 = vsub.f32 %v1218_v52, %v2134_v8  ;;  %v1158_v58 = vadd.f32 %v1601_v55, %v902_v53  ;;  %v1152_v59 = vpop.f32.mrb[23].mxu1 }
 0x23f   : > { %v1251_v61 = vadd.f32 %v1239_v30, %v2128_v34  ;;  %v1229_v50 = vsub.f32 %v1217_v54, %v2138_v43  ;;  %v1153_v62 = vadd.f32 %v1152_v59, %v897_v56  ;;  %v1207_v34 = vadd.f32 0.5, %v1195_v60 }
 0x240   : > { %1265 = vst.msk [vmem:[%s2250_s11 + $0x38] sm:$0xff] %vm1257_vm1, %v1252_v57  ;;  %v1242_v63 = vmul.f32 %v1230_v11, %v1206_v29  ;;  %v1220_v0 = vmax.f32 %v1158_v58, 0.0 }
 0x241   : > { %1264 = vst.msk [vmem:[%s2250_s11 + $0x30] sm:$0xff] %vm1257_vm1, %v1251_v61  ;;  %v1241_v12 = vmul.f32 %v1229_v50, %v1205_v9  ;;  %v1219_v51 = vmax.f32 %v1153_v62, 0.0 }
 0x242   : > { %v1254_v3 = vadd.f32 %v1242_v63, %v2134_v8  ;;  %v1232_v4 = vsub.f32 %v1220_v0, %v2144_v48 }
 0x243   : > { %v1253_v26 = vadd.f32 %v1241_v12, %v2138_v43  ;;  %v1231_v5 = vsub.f32 %v1219_v51, %v2147_v25 }
 0x244   : > { %1267 = vst.msk [vmem:[%s2250_s11 + $0x48] sm:$0xff] %vm1257_vm1, %v1254_v3  ;;  %v1244_v10 = vmul.f32 %v1232_v4, %v1208_v1 }
 0x245   : > { %1266 = vst.msk [vmem:[%s2250_s11 + $0x40] sm:$0xff] %vm1257_vm1, %v1253_v26  ;;  %v1243_v13 = vmul.f32 %v1231_v5, %v1207_v34 }
 0x246   : > { %v1256_v16 = vadd.f32 %v1244_v10, %v2144_v48 }
 0x247   : > { %v1255_v15 = vadd.f32 %v1243_v13, %v2147_v25 }
 0x248   : > { %1269 = vst.msk [vmem:[%s2250_s11 + $0x58] sm:$0xff] %vm1257_vm1, %v1256_v16 }
 0x249   : > { %1268 = vst.msk [vmem:[%s2250_s11 + $0x50] sm:$0xff] %vm1257_vm1, %v1255_v15 }
 0x24a PF: > { %s13_s14 = sadd.s32 1, %s1748_s14   ;;  %s2311_s12 = smov %s1744_s13 }
 0x24b   : > { %p10_p5 = scmp.ge.s32.totalorder %s13_s14, 4   ;;  %s2312_s13 = smov %s2314_s15 }
 0x24d   :  { %12 = sbr.rel (!%p10_p5) target bundleno = 2 (0x2), region = 62 }

</bundles_post_ra>
